<compile_context>
chip_gen: v7x
topology: tpu7x:2x2x1
jax: 0.10.0
libtpu: 0.0.40
codegen_flags: <defaults>
</compile_context>

<pallas_src>
import math
from functools import partial

import jax
import jax.numpy as jnp
from jax.experimental import pallas as pl
from jax.experimental.pallas import tpu as pltpu


def _round_up(x: int, m: int) -> int:
    return ((x + m - 1) // m) * m


def _fit_tiles(dim: int, max_tile: int, align: int):
    """Smallest aligned tile that covers `dim` with the fewest blocks (minimal padding).

    Returns (tile, num_blocks, padded_dim)."""
    padded_min = _round_up(dim, align)
    if padded_min <= max_tile:
        return padded_min, 1, padded_min
    n = -(-padded_min // max_tile)                  # cdiv
    tile = _round_up(-(-padded_min // n), align)
    return tile, n, tile * n


# --------------------------------------------------------------------------------------
# Kernels
# --------------------------------------------------------------------------------------

def _eqlinear_kernel(x_ref, wt_ref, b_ref, o_ref, *, fused_lrelu, neg_slope, act_scale):
    """Single-K fast path: one MXU pass + fused bias/leaky-relu epilogue, no scratch."""
    y = jnp.dot(x_ref[...], wt_ref[...], preferred_element_type=jnp.float32)
    y = y + b_ref[...]                              # bias already *lr_mul, f32, (1, tn)
    if fused_lrelu:
        y = jnp.where(y >= 0.0, y, y * neg_slope) * act_scale
    o_ref[...] = y.astype(o_ref.dtype)


def _eqlinear_kernel_kacc(x_ref, wt_ref, b_ref, o_ref, acc_ref, *,
                          fused_lrelu, neg_slope, act_scale):
    """General path: K (reduction) is the last grid axis, f32 VMEM accumulator."""
    k = pl.program_id(2)

    @pl.when(k == 0)
    def _():
        acc_ref[...] = jnp.zeros_like(acc_ref)

    acc_ref[...] += jnp.dot(x_ref[...], wt_ref[...], preferred_element_type=jnp.float32)

    @pl.when(k == pl.num_programs(2) - 1)
    def _():
        y = acc_ref[...] + b_ref[...]
        if fused_lrelu:
            y = jnp.where(y >= 0.0, y, y * neg_slope) * act_scale
        o_ref[...] = y.astype(o_ref.dtype)


# --------------------------------------------------------------------------------------
# One-time parameter preparation (hoisted out of the forward pass)
# --------------------------------------------------------------------------------------

def prepare_equal_linear_params(weight, bias, lr_mul=1.0, *,
                                weight_dtype=jnp.float32, tn_max=512, tk_max=512):
    """Fold the equalized-lr scale into the weight, transpose to (K, N), pad K/N to tile
    multiples, prescale/pad the bias.  Call once at init, NOT per forward."""
    N, K = weight.shape
    scale = (1.0 / math.sqrt(K)) * lr_mul

    tk, n_k, Kp = _fit_tiles(K, tk_max, 128)
    tn, n_n, Np = _fit_tiles(N, tn_max, 128)

    wt = (weight.astype(jnp.float32) * scale).T      # (K, N): out-channels on the lane axis
    wt = jnp.pad(wt, ((0, Kp - K), (0, Np - N))).astype(weight_dtype)

    b = (jnp.zeros((N,), jnp.float32) if bias is None
         else bias.astype(jnp.float32) * lr_mul)
    b = jnp.pad(b.reshape(1, N), ((0, 0), (0, Np - N)))

    return dict(wt=wt, b=b, K=K, N=N, tk=tk, n_k=n_k, tn=tn, n_n=n_n)


# --------------------------------------------------------------------------------------
# Forward
# --------------------------------------------------------------------------------------

def equal_linear_forward(x, params, activation=None, *, tm_max=256):
    """x: (..., K) -> (..., N) using prepared params from prepare_equal_linear_params."""
    K, N = params["K"], params["N"]
    assert x.shape[-1] == K, "input feature size mismatch"
    lead = x.shape[:-1]
    x2 = x.reshape(-1, K)
    M = x2.shape[0]
    out_dtype = x.dtype

    wt, b = params["wt"], params["b"]
    Kp, Np = wt.shape
    tk, n_k = params["tk"], params["n_k"]
    tn, n_n = params["tn"], params["n_n"]

    tm, n_m, Mp = _fit_tiles(M, tm_max, 8)

    # v7x megacore: if the parallel (M, N) part of the grid is a single block, split N into
    # two lane-dense tiles so both TensorCores get work (tn stays a multiple of 128).
    if n_m * n_n == 1 and tn % 256 == 0:
        tn //= 2
        n_n = 2

    xp = x2
    if wt.dtype != xp.dtype:
        # bf16 weight storage: default MXU precision truncates to bf16 anyway.
        xp = xp.astype(wt.dtype)
    if Mp != M or Kp != K:
        xp = jnp.pad(xp, ((0, Mp - M), (0, Kp - K)))

    kern_kwargs = dict(fused_lrelu=(activation == 'fused_lrelu'),
                       neg_slope=0.2, act_scale=math.sqrt(2.0))

    if n_k == 1:
        # Fast path: one weight DMA + one MXU pass per (i, j) tile; no accumulator scratch.
        out_p = pl.pallas_call(
            partial(_eqlinear_kernel, **kern_kwargs),
            out_shape=jax.ShapeDtypeStruct((Mp, Np), out_dtype),
            grid_spec=pltpu.PrefetchScalarGridSpec(
                num_scalar_prefetch=0,
                grid=(n_m, n_n),
                in_specs=[
                    pl.BlockSpec((tm, Kp), lambda i, j: (i, 0)),   # x tile
                    pl.BlockSpec((Kp, tn), lambda i, j: (0, j)),   # (W*scale).T tile
                    pl.BlockSpec((1, tn), lambda i, j: (0, j)),    # bias*lr_mul tile
                ],
                out_specs=pl.BlockSpec((tm, tn), lambda i, j: (i, j)),
            ),
            compiler_params=pltpu.CompilerParams(
                dimension_semantics=("parallel", "parallel")),
        )(xp, wt, b)
    else:
        out_p = pl.pallas_call(
            partial(_eqlinear_kernel_kacc, **kern_kwargs),
            out_shape=jax.ShapeDtypeStruct((Mp, Np), out_dtype),
            grid_spec=pltpu.PrefetchScalarGridSpec(
                num_scalar_prefetch=0,
                grid=(n_m, n_n, n_k),
                in_specs=[
                    pl.BlockSpec((tm, tk), lambda i, j, k: (i, k)),
                    pl.BlockSpec((tk, tn), lambda i, j, k: (k, j)),
                    pl.BlockSpec((1, tn), lambda i, j, k: (0, j)),
                ],
                out_specs=pl.BlockSpec((tm, tn), lambda i, j, k: (i, j)),
                scratch_shapes=[pltpu.VMEM((tm, tn), jnp.float32)],
            ),
            compiler_params=pltpu.CompilerParams(
                dimension_semantics=("parallel", "parallel", "arbitrary")),
        )(xp, wt, b)

    return out_p[:M, :N].reshape(lead + (N,))


# --------------------------------------------------------------------------------------
# Module
# --------------------------------------------------------------------------------------

class EqualLinear:
    """JAX/Pallas port of GFPGAN's EqualLinear (forward only)."""

    def __init__(self, in_channels, out_channels, bias=True, bias_init_val=0.0,
                 lr_mul=1.0, activation=None, *, key, weight_dtype=jnp.float32):
        if activation not in ('fused_lrelu', None):
            raise ValueError(
                f"Wrong activation value in EqualLinear: {activation}. "
                "Supported ones are: ['fused_lrelu', None].")
        self.in_channels = in_channels
        self.out_channels = out_channels
        self.lr_mul = lr_mul
        self.activation = activation
        self.scale = 1 / math.sqrt(in_channels) * lr_mul
        self.weight_dtype = weight_dtype
        # torch.randn(out, in).div_(lr_mul)
        self.weight = jax.random.normal(
            key, (out_channels, in_channels), dtype=jnp.float32) / lr_mul
        self.bias = (jnp.full((out_channels,), float(bias_init_val), jnp.float32)
                     if bias else None)
        self._prepare()
        # TODO(synk): backward (FusedLeakyReLUFunctionBackward) not ported; forward only.

    def load_params(self, weight=None, bias=None):
        """Replace parameters (e.g. from a PyTorch state dict) and re-run the one-time prep."""
        if weight is not None:
            self.weight = weight
        if bias is not None:
            self.bias = bias
        self._prepare()

    def _prepare(self):
        self._params = prepare_equal_linear_params(
            self.weight, self.bias, self.lr_mul, weight_dtype=self.weight_dtype)

    def __call__(self, x):
        return equal_linear_forward(x, self._params, activation=self.activation)


# --------------------------------------------------------------------------------------
# Reference + self-test
# --------------------------------------------------------------------------------------

def _ref_equal_linear(x, weight, bias, lr_mul, activation):
    """Pure-JAX reference matching the PyTorch forward."""
    scale = (1.0 / math.sqrt(x.shape[-1])) * lr_mul
    out = x @ (weight * scale).T
    b = None if bias is None else bias * lr_mul
    if activation == 'fused_lrelu':
        out = out + b
        out = jnp.where(out >= 0, out, 0.2 * out) * math.sqrt(2.0)
    elif b is not None:
        out = out + b
    return out


if __name__ == "__main__":
    key = jax.random.PRNGKey(0)
    k_w1, k_x1, k_b1, k_w2, k_w3, k_x3, k_b3 = jax.random.split(key, 7)

    # --- Test 1: fused_lrelu path (GFPGAN style MLP), lr_mul != 1, random bias ---
    batch, in_ch, out_ch = 2, 32, 32
    x1 = jax.random.normal(k_x1, (batch, in_ch), dtype=jnp.float32)
    mod1 = EqualLinear(in_ch, out_ch, bias=True, bias_init_val=0.0,
                       lr_mul=0.01, activation='fused_lrelu', key=k_w1)
    mod1.load_params(bias=jax.random.normal(k_b1, (out_ch,), dtype=jnp.float32))
    out1 = jax.block_until_ready(mod1(x1))
    ref1 = _ref_equal_linear(x1, mod1.weight, mod1.bias, mod1.lr_mul, mod1.activation)
    assert out1.shape == (batch, out_ch)
    assert out1.dtype == x1.dtype
    assert jnp.allclose(out1, ref1, atol=1e-4, rtol=1e-4)

    # --- Test 2: plain linear path (activation=None), constant nonzero bias ---
    mod2 = EqualLinear(in_ch, out_ch, bias=True, bias_init_val=0.3,
                       activation=None, key=k_w2)
    out2 = jax.block_until_ready(mod2(x1))
    ref2 = _ref_equal_linear(x1, mod2.weight, mod2.bias, mod2.lr_mul, mod2.activation)
    assert jnp.allclose(out2, ref2, atol=1e-4, rtol=1e-4)

    # --- Test 3: multi-K accumulator path + megacore N split (K tiled into 2 blocks) ---
    M3, K3, N3 = 10, 768, 256
    x3 = jax.random.normal(k_x3, (M3, K3), dtype=jnp.float32)
    mod3 = EqualLinear(K3, N3, bias=True, bias_init_val=0.0,
                       lr_mul=1.0, activation='fused_lrelu', key=k_w3)
    mod3.load_params(bias=jax.random.normal(k_b3, (N3,), dtype=jnp.float32))
    out3 = jax.block_until_ready(mod3(x3))
    ref3 = _ref_equal_linear(x3, mod3.weight, mod3.bias, mod3.lr_mul, mod3.activation)
    assert out3.shape == (M3, N3)
    assert jnp.allclose(out3, ref3, atol=1e-4, rtol=1e-4)

    print("KERNEL_OK")
</pallas_src>

<mosaic_0001>
module attributes {stable_mosaic.version = 11 : i64} {
  func.func @_eqlinear_kernel(%arg0: i32, %arg1: i32, %arg2: memref<8x128xf32, #tpu.memory_space<vmem>>, %arg3: memref<128x128xf32, #tpu.memory_space<vmem>>, %arg4: memref<1x128xf32, #tpu.memory_space<vmem>>, %arg5: memref<8x128xf32, #tpu.memory_space<vmem>>) attributes {dimension_semantics = [#tpu.dimension_semantics<parallel>, #tpu.dimension_semantics<parallel>], iteration_bounds = array<i64: 1, 1>, scalar_prefetch = 0 : i64, scratch_operands = 0 : i64, tpu.core_type = #tpu.core_type<tc>, window_params = [{transform_indices = @transform_0, window_bounds = array<i64: 8, 128>}, {transform_indices = @transform_1, window_bounds = array<i64: 128, 128>}, {transform_indices = @transform_2, window_bounds = array<i64: 1, 128>}, {transform_indices = @transform_3, window_bounds = array<i64: 8, 128>}]} {
    %c0 = arith.constant 0 : index
    %c0_0 = arith.constant 0 : index
    %0 = vector.load %arg2[%c0, %c0_0] : memref<8x128xf32, #tpu.memory_space<vmem>>, vector<8x128xf32>
    %c0_1 = arith.constant 0 : index
    %c0_2 = arith.constant 0 : index
    %1 = vector.load %arg3[%c0_1, %c0_2] : memref<128x128xf32, #tpu.memory_space<vmem>>, vector<128x128xf32>
    %cst = arith.constant dense<0.000000e+00> : vector<8x128xf32>
    %2 = tpu.matmul %0, %1, %cst {dimension_numbers = #tpu.dot_dimension_numbers<[1], [0], [0], [1], [0, 0, 1, 1], [], []>} : vector<8x128xf32>, vector<128x128xf32>, vector<8x128xf32> -> vector<8x128xf32>
    %c0_3 = arith.constant 0 : index
    %c0_4 = arith.constant 0 : index
    %3 = vector.load %arg4[%c0_3, %c0_4] : memref<1x128xf32, #tpu.memory_space<vmem>>, vector<1x128xf32>
    %4 = vector.broadcast %3 : vector<1x128xf32> to vector<8x128xf32>
    %5 = arith.addf %2, %4 : vector<8x128xf32>
    %cst_5 = arith.constant 0.000000e+00 : f32
    %6 = vector.broadcast %cst_5 : f32 to vector<8x128xf32>
    %7 = arith.cmpf oge, %5, %6 : vector<8x128xf32>
    %cst_6 = arith.constant 2.000000e-01 : f32
    %8 = vector.broadcast %cst_6 : f32 to vector<8x128xf32>
    %9 = arith.mulf %5, %8 : vector<8x128xf32>
    %10 = arith.select %7, %5, %9 : vector<8x128xi1>, vector<8x128xf32>
    %cst_7 = arith.constant 1.41421354 : f32
    %11 = vector.broadcast %cst_7 : f32 to vector<8x128xf32>
    %12 = arith.mulf %10, %11 : vector<8x128xf32>
    %c0_8 = arith.constant 0 : index
    %c0_9 = arith.constant 0 : index
    %13 = vector.load %arg5[%c0_8, %c0_9] : memref<8x128xf32, #tpu.memory_space<vmem>>, vector<8x128xf32>
    tpu.vector_store %arg5[%c0_8, %c0_9], %12 {strides = array<i32>} : memref<8x128xf32, #tpu.memory_space<vmem>>, vector<8x128xf32>,
    return
  }
  func.func @transform_0(%arg0: i32, %arg1: i32) -> (i32, i32) {
    %c0_i32 = arith.constant 0 : i32
    %c0_i32_0 = arith.constant 0 : i32
    return %arg0, %c0_i32 : i32, i32
  }
  func.func @transform_1(%arg0: i32, %arg1: i32) -> (i32, i32) {
    %c0_i32 = arith.constant 0 : i32
    %c0_i32_0 = arith.constant 0 : i32
    return %c0_i32, %arg1 : i32, i32
  }
  func.func @transform_2(%arg0: i32, %arg1: i32) -> (i32, i32) {
    %c0_i32 = arith.constant 0 : i32
    %c0_i32_0 = arith.constant 0 : i32
    return %c0_i32, %arg1 : i32, i32
  }
  func.func @transform_3(%arg0: i32, %arg1: i32) -> (i32, i32) {
    %c0_i32 = arith.constant 0 : i32
    return %arg0, %arg1 : i32, i32
  }
}

</mosaic_0001>

<bundles_post_ra>
// kernel: tpu_custom_call.1
= control target key start
LH: loop header
LB: loop body
LE: loop exit
PB: predicated region body
PF: predicated region fallthrough
CT: control target
= control target key end

     0   :  { %8 = vsyncpa [#allocation3], 0  ;;  %s387_s0 = inlined_call_operand.hbm [shape: f32[8,128], index: 0, kind: input, shape index: {}]   ;;  %s388_s1 = inlined_call_operand.hbm [shape: f32[128,128], index: 1, kind: input, shape index: {}]   ;;  %s389_s2 = inlined_call_operand.vmem [shape: f32[1,128], index: 2, kind: input, shape index: {}]   ;;  %s390_s3 = inlined_call_operand.hbm [shape: f32[8,128], index: 3, kind: output, shape index: {}]  }
   0x1   :  { %9 = vsyncpa [#allocation6], 0 }
   0x2   :  { %10 = vsyncpa [#allocation4], 0  ;;  %s313_s12 = smov [#allocation2]   ;;  %s314_s14 = smov [#allocation5]  }
   0x3   :  { %s17_s13 = sshll.u32 %s313_s12, 4  ;;  %s26_s15 = sshll.u32 %s314_s14, 4  ;;  %s18_s13 = int_to_ptr.vmem [resolvable:$true] %s17_s13  ;;  %s341_s15 = int_to_ptr.vmem [resolvable:$true] %s26_s15 }
   0x4   :  { %s241_s18 = scalar_lea.hbm %s387_s0, 128 }
   0x5   :  { %p242_p0 = scmp.ne.s32.totalorder %s387_s0, %s241_s18  ;;  %p245_p1 = scmp.lt.u32.totalorder %s241_s18, %s387_s0 }
   0x7   :  { %p247_p2 = pnand %p245_p1, %p242_p0 }
   0x9   :  { %250 = shalt.err (!%p247_p2)
}
   0xa   :  { %s251_s23 = scalar_lea.vmem %s18_s13, 128  ;;  %p256_p4 = scmp.lt.s32.totalorder %s18_s13, %s18_s13 }
   0xb   :  { %p252_p3 = scmp.ne.s32.totalorder %s18_s13, %s251_s23  ;;  %p257_p5 = scmp.lt.s32.totalorder %s251_s23, %s251_s23 }
   0xd   :  { %p258_p6 = por %p257_p5, %p256_p4 }
   0xf   :  { %p259_p7 = pnand %p258_p6, %p252_p3 }
  0x11   :  { %262 = shalt.err (!%p259_p7)
}
  0x12   :  { %20 = dma.hbm_to_vmem [thread:$0]  %s387_s0, 128, %s18_s13, [#allocation3]  }
  0x13   :  { %s263_s28 = scalar_lea.hbm %s388_s1, 2048 }
  0x14   :  { %p264_p8 = scmp.ne.s32.totalorder %s388_s1, %s263_s28  ;;  %p267_p9 = scmp.lt.u32.totalorder %s263_s28, %s388_s1 }
  0x16   :  { %p269_p10 = pnand %p267_p9, %p264_p8 }
  0x18   :  { %272 = shalt.err (!%p269_p10)
}
  0x19   :  { %s273_s6 = scalar_lea.vmem %s341_s15, 2048  ;;  %p278_p12 = scmp.lt.s32.totalorder %s341_s15, %s341_s15 }
  0x1a   :  { %p274_p11 = scmp.ne.s32.totalorder %s341_s15, %s273_s6  ;;  %p279_p13 = scmp.lt.s32.totalorder %s273_s6, %s273_s6 }
  0x1c   :  { %p280_p0 = por %p279_p13, %p278_p12 }
  0x1e   :  { %p281_p1 = pnand %p280_p0, %p274_p11 }
  0x20   :  { %284 = shalt.err (!%p281_p1)
}
  0x21   :  { %s315_s0 = smov 128   ;;  %s316_s7 = smov 8  }
  0x22   :  { %32 = dma.hbm_to_vmem [thread:$0]  %s388_s1, 2048, %s341_s15, [#allocation6], %s315_s0, %s315_s0, %s316_s7  }
  0x23   :  { %307 = dma.done.wait [#allocation3], 128  }
  0x24   :  { %308 = vsyncadd [#allocation3], 4294967168 }
  0x25   :  { %309 = dma.done.wait [#allocation6], 2048  }
  0x26   :  { %310 = vsyncadd [#allocation6], 4294965248  ;;  %v317_v0 = vmov 0.0|0.0   ;;  %vm318_vm0 = vmmov 0   ;;  %v319_v1 = vmov 0.0   ;;  %v42_v2 = vld [vmem:[#allocation5] sm:$0xff] }
  0x27   :  { %209 = vmatprep.subr.bf16.mxu0 %v317_v0  ;;  %206 = vmatprep.mubr.msk.f32.mxu0 %vm318_vm0, %v319_v1  ;;  %v43_v3 = vld [vmem:[#allocation5 + $0x8] sm:$0xff]  ;;  %v44_v4 = vld [vmem:[#allocation5 + $0x10] sm:$0xff]  ;;  %v45_v6 = vld [vmem:[#allocation5 + $0x18] sm:$0xff]  ;;  %s320_s11 = smov [#allocation7]  }
  0x28   :  { %v210_v5 = vpack.c.bf16 %v43_v3, %v42_v2  ;;  %v213_v7 = vpack.c.bf16 %v45_v6, %v44_v4  ;;  %v46_v8 = vld [vmem:[#allocation5 + $0x20] sm:$0xff]  ;;  %v47_v9 = vld [vmem:[#allocation5 + $0x28] sm:$0xff]  ;;  %v48_v11 = vld [vmem:[#allocation5 + $0x30] sm:$0xff]  ;;  %s146_s12 = sshll.u32 %s320_s11, 4  ;;  %s147_s12 = int_to_ptr.vmem [resolvable:$true] %s146_s12 }
  0x29   :  { %v216_v10 = vpack.c.bf16 %v47_v9, %v46_v8  ;;  %v49_v12 = vld [vmem:[#allocation5 + $0x38] sm:$0xff]  ;;  %v50_v14 = vld [vmem:[#allocation5 + $0x40] sm:$0xff]  ;;  %v51_v15 = vld [vmem:[#allocation5 + $0x48] sm:$0xff]  ;;  %s285_s13 = scalar_lea.vmem %s147_s12, 128  ;;  %p290_p3 = scmp.lt.s32.totalorder %s147_s12, %s147_s12 }
  0x2a   :  { %211 = vmatpush3.bf16.msra.mxu0 %v210_v5  ;;  %v219_v13 = vpack.c.bf16 %v49_v12, %v48_v11  ;;  %v222_v16 = vpack.c.bf16 %v51_v15, %v50_v14  ;;  %v52_v17 = vld [vmem:[#allocation5 + $0x50] sm:$0xff]  ;;  %v53_v18 = vld [vmem:[#allocation5 + $0x58] sm:$0xff]  ;;  %v54_v20 = vld [vmem:[#allocation5 + $0x60] sm:$0xff]  ;;  %p286_p2 = scmp.ne.s32.totalorder %s147_s12, %s285_s13  ;;  %p291_p4 = scmp.lt.s32.totalorder %s285_s13, %s285_s13 }
  0x2b   :  { %212 = vmatprep.subr.bf16.mxu0 %v317_v0  ;;  %v225_v19 = vpack.c.bf16 %v53_v18, %v52_v17  ;;  %v55_v21 = vld [vmem:[#allocation5 + $0x68] sm:$0xff]  ;;  %v56_v23 = vld [vmem:[#allocation5 + $0x70] sm:$0xff]  ;;  %v57_v24 = vld [vmem:[#allocation5 + $0x78] sm:$0xff] }
  0x2c   :  { %v228_v22 = vpack.c.bf16 %v55_v21, %v54_v20  ;;  %v231_v25 = vpack.c.bf16 %v57_v24, %v56_v23  ;;  %v41_v26 = vld [vmem:[#allocation2] sm:$0xff]  ;;  %p292_p5 = por %p291_p4, %p290_p3 }
  0x2d   :  { %v156_v27 = vld [vmem:[%s389_s2] ss:$0 sm:$0xff] }
  0x2e   :  { %214 = vmatpush3.bf16.msra.mxu0 %v213_v7  ;;  %p293_p6 = pnand %p292_p5, %p286_p2 }
  0x2f   :  { %215 = vmatprep.subr.bf16.mxu0 %v317_v0 }
  0x32   :  { %217 = vmatpush3.bf16.msra.mxu0 %v216_v10 }
  0x33   :  { %218 = vmatprep.subr.bf16.mxu0 %v317_v0 }
  0x36   :  { %220 = vmatpush3.bf16.msra.mxu0 %v219_v13 }
  0x37   :  { %221 = vmatprep.subr.bf16.mxu0 %v317_v0 }
  0x3a   :  { %223 = vmatpush3.bf16.msra.mxu0 %v222_v16 }
  0x3b   :  { %224 = vmatprep.subr.bf16.mxu0 %v317_v0 }
  0x3e   :  { %226 = vmatpush3.bf16.msra.mxu0 %v225_v19 }
  0x3f   :  { %227 = vmatprep.subr.bf16.mxu0 %v317_v0 }
  0x42   :  { %229 = vmatpush3.bf16.msra.mxu0 %v228_v22 }
  0x43   :  { %230 = vmatprep.subr.bf16.mxu0 %v317_v0 }
  0x46   :  { %232 = vmatpush3.bf16.msra.mxu0 %v231_v25 }
  0x49   :  { %207 = vmatmul.mubr.f32.vlgmr.msra.gmra.mrb[0].mxu0 %v41_v26 }
 0x11c   :  { %v131_v28 = vpop.f32.mrb[0].mxu0 }
 0x11d   :  { %v132_v29 = vadd.f32 %v156_v27, %v131_v28  ;;  %v208_v30 = vpop.f32.mrb[1].mxu0 }
 0x11f   :  { %vm135_vm1 = vcmp.ge.f32.partialorder %v132_v29, 0.0  ;;  %v136_v31 = vmul.f32 0.2, %v132_v29 }
 0x121   :  { %v137_v32 = vsel %vm135_vm1, %v132_v29, %v136_v31 }
 0x122   :  { %v138_v33 = vmul.f32 1.4142135, %v137_v32 }
 0x124   :  { %139 = vst [vmem:[#allocation7] sm:$0xff] %v138_v33 }
 0x125   :  { %296 = shalt.err (!%p293_p6)
}
 0x126   :  { %s297_s15 = scalar_lea.hbm %s390_s3, 128 }
 0x127   :  { %p298_p7 = scmp.ne.s32.totalorder %s390_s3, %s297_s15  ;;  %p301_p8 = scmp.lt.u32.totalorder %s297_s15, %s390_s3 }
 0x129   :  { %p303_p9 = pnand %p301_p8, %p298_p7 }
 0x12b   :  { %306 = shalt.err (!%p303_p9)
}
 0x12c   :  { %149 = dma.vmem_to_hbm [thread:$0]  %s147_s12, 128, %s390_s3, [#allocation4]  }
 0x12d   :  { %311 = dma.done.wait [#allocation4], 128  }
 0x12e   :  { %312 = vsyncadd [#allocation4], 4294967168 }
 0x12f   :  { %153 = vsyncpa [#allocation3], 1 }
 0x130   :  { %154 = vsyncpa [#allocation6], 1 }
 0x131   :  { %155 = vsyncpa [#allocation4], 1 }

</bundles_post_ra>
